<compile_context>
chip_gen: v5e
topology: v5e:2x2
jax: 0.10.0
libtpu: 0.0.40
codegen_flags: <defaults>
</compile_context>

<pallas_src>
import math

import jax
import jax.numpy as jnp
from jax.experimental import pallas as pl
from jax.experimental.pallas import tpu as pltpu


def _round_up8(v):
    return ((v + 7) // 8) * 8


# --------------------------------------------------------------------------
# Fused kernel
# --------------------------------------------------------------------------
def _make_fused_tcn_kernel(layer_meta, *, K, batch_tile, compute_dtype):
    """Ref order: x, then per layer (w1[K,ci,co], w2[K,co,co], [wd[ci,co]],
    biases[nb,co]), then w_lin_row[1,c_last], b_lin[1,1], out[1,1,Bt]."""
    Bt = batch_tile

    def kernel(*refs):
        x_ref = refs[0]
        out_ref = refs[-1]
        idx = 1

        a = x_ref[...].astype(jnp.float32)                  # (Bt, A0, C_in)

        for m in layer_meta:
            d = m["dilation"]
            P = (K - 1) * d
            M, T = m["m_mid"], m["t_out"]

            w1_ref = refs[idx]
            w2_ref = refs[idx + 1]
            idx += 2
            wd_ref = None
            if m["has_downsample"]:
                wd_ref = refs[idx]
                idx += 1
            b_ref = refs[idx]                                # (nb, c_out) f32
            idx += 1

            def conv_relu(h, w_ref, bias, m_out, d=d, P=P):
                # h: (Bt, A_h, c_in) f32 -> relu(causal dilated conv), the
                # trailing m_out timesteps: (Bt, m_out, c_out).
                A_h, c_in = h.shape[1], h.shape[2]
                c_out = w_ref.shape[-1]
                pad = m_out + P - A_h
                if pad > 0:
                    # Zero rows == original causal zero padding; pad > 0 only
                    # happens when A_h == L, so zeros land exactly on t < 0.
                    h = jnp.concatenate(
                        [jnp.zeros((Bt, pad, c_in), h.dtype), h], axis=1)
                    A_h = A_h + pad
                off = A_h - (m_out + P)                      # >= 0
                hc = h.astype(compute_dtype)
                acc = None
                for k in range(K):                           # K-tap accumulation
                    s = off + k * d
                    xk = hc[:, s:s + m_out, :].reshape(Bt * m_out, c_in)
                    yk = jnp.dot(xk, w_ref[k],
                                 preferred_element_type=jnp.float32)
                    acc = yk if acc is None else acc + yk
                y = jnp.maximum(acc + bias, 0.0)             # f32 elementwise
                return y.reshape(Bt, m_out, c_out)

            h1 = conv_relu(a, w1_ref, b_ref[0:1, :], M)      # (Bt, M, c_out)
            h2 = conv_relu(h1, w2_ref, b_ref[1:2, :], T)     # (Bt, T, c_out)

            A_cur = a.shape[1]
            res = a[:, A_cur - T:, :]                        # 8-aligned start
            if wd_ref is not None:
                c_prev = res.shape[-1]
                c_out = wd_ref.shape[-1]
                r2 = jnp.dot(
                    res.astype(compute_dtype).reshape(Bt * T, c_prev),
                    wd_ref[...], preferred_element_type=jnp.float32)
                res = (r2 + b_ref[2:3, :]).reshape(Bt, T, c_out)
            a = jnp.maximum(h2 + res, 0.0)                   # (Bt, T, c_out)

        # Final Linear on the last timestep; produce a lane-dense (1, Bt) row.
        w_lin = refs[idx][...]                               # (1, c_last)
        b_lin = refs[idx + 1][...]                           # (1, 1) f32
        a_last_t = a[:, -1, :].T.astype(compute_dtype)       # (c_last, Bt)
        y = jnp.dot(w_lin, a_last_t,
                    preferred_element_type=jnp.float32) + b_lin   # (1, Bt)
        out_ref[...] = y.reshape(1, 1, Bt)

    return kernel


# --------------------------------------------------------------------------
# Wrapper
# --------------------------------------------------------------------------
def tcn_forward(x_ncl, params, *, kernel_size, batch_tile=None, use_bf16=True):
    """x_ncl: (N, C_in, L), PyTorch Conv1d layout. Returns (N, 1) float32."""
    N, c_in0, L = x_ncl.shape
    blocks = params["blocks"]
    num_levels = len(blocks)
    K = kernel_size
    compute_dtype = jnp.bfloat16 if use_bf16 else jnp.float32

    # Trailing-window lengths (causality: only the last timestep feeds the
    # Linear), rounded up to multiples of 8 for aligned slices and clamped at
    # L so in-kernel zero padding coincides with t < 0.
    t_out = [0] * num_levels
    m_mid = [0] * num_levels
    a_in = [0] * num_levels
    need = 1
    for i in range(num_levels - 1, -1, -1):
        P = (K - 1) * (2 ** i)
        t_out[i] = min(_round_up8(need), L)
        m_mid[i] = min(_round_up8(t_out[i] + P), L)
        a_in[i] = min(_round_up8(m_mid[i] + P), L)
        need = a_in[i]
    A0 = a_in[0]

    # Slice only the trailing window, NCL -> NLC (transpose touches the tail
    # only).  TODO(synk): fold slice+transpose into the kernel (NCL tile +
    # in-kernel transpose) to make the x DMA lane-dense and drop one HBM pass.
    x = jnp.transpose(x_ncl[:, :, L - A0:], (0, 2, 1)).astype(jnp.float32)

    # Batch tile: as large as possible (fills MXU rows, amortizes the ~0.35us
    # per-grid-step overhead) but always >= 2 grid steps when N >= 2 so both
    # v7x TensorCores get work; capped at 256 rows — VMEM stays KBs, far below
    # the 32 MiB scoped default even on v7x (64 MiB physical).
    if batch_tile is None:
        if N == 1:
            batch_tile = 1
        else:
            cap = min(N // 2, 256)
            batch_tile = max(d for d in range(1, cap + 1) if N % d == 0)
    assert N % batch_tile == 0, (N, batch_tile)
    G = N // batch_tile

    operands = [x]
    in_specs = [pl.BlockSpec((batch_tile, A0, c_in0), lambda n: (n, 0, 0))]
    layer_meta = []
    c_prev = c_in0
    for i, blk in enumerate(blocks):
        c_out = blk["w1"].shape[-1]
        has_ds = "wd" in blk
        operands.append(blk["w1"].astype(compute_dtype))     # (K, c_prev, c_out)
        in_specs.append(pl.BlockSpec((K, c_prev, c_out), lambda n: (0, 0, 0)))
        operands.append(blk["w2"].astype(compute_dtype))     # (K, c_out, c_out)
        in_specs.append(pl.BlockSpec((K, c_out, c_out), lambda n: (0, 0, 0)))
        bias_rows = [blk["b1"].reshape(1, c_out), blk["b2"].reshape(1, c_out)]
        if has_ds:
            operands.append(blk["wd"].astype(compute_dtype))  # (c_prev, c_out)
            in_specs.append(pl.BlockSpec((c_prev, c_out), lambda n: (0, 0)))
            bias_rows.append(blk["bd"].reshape(1, c_out))
        bpack = jnp.concatenate(bias_rows, axis=0).astype(jnp.float32)
        operands.append(bpack)                                # (nb, c_out)
        in_specs.append(pl.BlockSpec(bpack.shape, lambda n: (0, 0)))
        layer_meta.append(dict(dilation=2 ** i, has_downsample=has_ds,
                               m_mid=m_mid[i], t_out=t_out[i]))
        c_prev = c_out

    w_lin_row = params["w_lin"].reshape(1, c_prev).astype(compute_dtype)
    b_lin = params["b_lin"].reshape(1, 1).astype(jnp.float32)
    operands += [w_lin_row, b_lin]
    in_specs += [pl.BlockSpec((1, c_prev), lambda n: (0, 0)),
                 pl.BlockSpec((1, 1), lambda n: (0, 0))]

    kernel = _make_fused_tcn_kernel(layer_meta, K=K, batch_tile=batch_tile,
                                    compute_dtype=compute_dtype)

    out = pl.pallas_call(
        kernel,
        out_shape=jax.ShapeDtypeStruct((G, 1, batch_tile), jnp.float32),
        grid=(G,),
        in_specs=in_specs,
        out_specs=pl.BlockSpec((1, 1, batch_tile), lambda n: (n, 0, 0)),
        compiler_params=pltpu.CompilerParams(
            dimension_semantics=("parallel",)),   # batch tiles independent
    )(*operands)
    return out.reshape(N, 1)


# --------------------------------------------------------------------------
# Deterministic parameter init (shapes follow the PyTorch module)
# --------------------------------------------------------------------------
def init_params(key, input_dim, num_channels, kernel_size):
    blocks = []
    c_in = input_dim
    for c_out in num_channels:
        key, k1, k2, k3, k4, k5, k6 = jax.random.split(key, 7)
        s1 = 1.0 / math.sqrt(c_in * kernel_size)
        s2 = 1.0 / math.sqrt(c_out * kernel_size)
        blk = {
            "w1": jax.random.uniform(k1, (kernel_size, c_in, c_out),
                                     jnp.float32, -s1, s1),
            "b1": jax.random.uniform(k2, (1, c_out), jnp.float32, -s1, s1),
            "w2": jax.random.uniform(k3, (kernel_size, c_out, c_out),
                                     jnp.float32, -s2, s2),
            "b2": jax.random.uniform(k4, (1, c_out), jnp.float32, -s2, s2),
        }
        if c_in != c_out:   # 1x1 downsample only when needed
            sd = 1.0 / math.sqrt(c_in)
            blk["wd"] = jax.random.uniform(k5, (c_in, c_out),
                                           jnp.float32, -sd, sd)
            blk["bd"] = jax.random.uniform(k6, (1, c_out),
                                           jnp.float32, -sd, sd)
        blocks.append(blk)
        c_in = c_out
    key, kl, kb = jax.random.split(key, 3)
    sl = 1.0 / math.sqrt(num_channels[-1])
    return {
        "blocks": blocks,
        "w_lin": jax.random.uniform(kl, (num_channels[-1], 1),
                                    jnp.float32, -sl, sl),
        "b_lin": jax.random.uniform(kb, (1, 1), jnp.float32, -sl, sl),
    }


# --------------------------------------------------------------------------
# Pure-JAX reference (full-length computation, correctness check only)
# --------------------------------------------------------------------------
def _ref_block(x, blk, K, d):
    N, L, c_in = x.shape
    P = (K - 1) * d

    def causal_conv(inp, w, b):
        ip = jnp.pad(inp, ((0, 0), (P, 0), (0, 0)))
        out = jnp.zeros((N, L, w.shape[-1]), jnp.float32) + b
        for k in range(K):
            out = out + jnp.einsum('nlc,co->nlo', ip[:, k * d:k * d + L, :], w[k])
        return out

    h1 = jax.nn.relu(causal_conv(x, blk["w1"], blk["b1"]))
    h2 = jax.nn.relu(causal_conv(h1, blk["w2"], blk["b2"]))
    if "wd" in blk:
        res = jnp.einsum('nlc,co->nlo', x, blk["wd"]) + blk["bd"]
    else:
        res = x
    return jax.nn.relu(h2 + res)


def tcn_ref(x_ncl, params, kernel_size):
    x = jnp.transpose(x_ncl, (0, 2, 1))
    for i, blk in enumerate(params["blocks"]):
        x = _ref_block(x, blk, kernel_size, 2 ** i)
    return x[:, -1, :] @ params["w_lin"] + params["b_lin"]


# --------------------------------------------------------------------------
if __name__ == "__main__":
    key = jax.random.PRNGKey(0)
    kp, kx = jax.random.split(key)

    N, input_dim, L = 8, 4, 16
    num_channels = [8, 8]          # downsample (4->8) + identity (8->8) blocks
    kernel_size = 3

    params = init_params(kp, input_dim, num_channels, kernel_size)
    x = jax.random.normal(kx, (N, input_dim, L), jnp.float32)   # PyTorch NCL

    fwd = jax.jit(tcn_forward,
                  static_argnames=("kernel_size", "batch_tile", "use_bf16"))

    # f32 matmul path: tight check against the pure-JAX reference.
    out = jax.block_until_ready(
        fwd(x, params, kernel_size=kernel_size, use_bf16=False))
    ref = tcn_ref(x, params, kernel_size)
    assert out.shape == (N, 1), out.shape
    assert jnp.allclose(out, ref, atol=1e-4, rtol=1e-4), (out, ref)

    # bf16-operand / f32-accumulation production path: loose tolerance.
    out_bf16 = jax.block_until_ready(
        fwd(x, params, kernel_size=kernel_size, use_bf16=True))
    assert out_bf16.shape == (N, 1), out_bf16.shape
    assert jnp.allclose(out_bf16, ref, atol=1.5e-1, rtol=1.5e-1), (out_bf16, ref)

    # L shorter than the receptive field: in-kernel causal zero-pad path.
    xs = x[:, :, :8]
    out2 = jax.block_until_ready(
        fwd(xs, params, kernel_size=kernel_size, use_bf16=False))
    ref2 = tcn_ref(xs, params, kernel_size)
    assert jnp.allclose(out2, ref2, atol=1e-4, rtol=1e-4), (out2, ref2)

    print("KERNEL_OK")
</pallas_src>

<mosaic_0001>
module attributes {stable_mosaic.version = 11 : i64} {
  func.func @kernel(%arg0: i32, %arg1: memref<4x16x4xf32, #tpu.memory_space<vmem>>, %arg2: memref<3x4x8xf32, #tpu.memory_space<vmem>>, %arg3: memref<3x8x8xf32, #tpu.memory_space<vmem>>, %arg4: memref<4x8xf32, #tpu.memory_space<vmem>>, %arg5: memref<3x8xf32, #tpu.memory_space<vmem>>, %arg6: memref<3x8x8xf32, #tpu.memory_space<vmem>>, %arg7: memref<3x8x8xf32, #tpu.memory_space<vmem>>, %arg8: memref<2x8xf32, #tpu.memory_space<vmem>>, %arg9: memref<1x8xf32, #tpu.memory_space<vmem>>, %arg10: memref<1x1xf32, #tpu.memory_space<vmem>>, %arg11: memref<1x1x4xf32, #tpu.memory_space<vmem>>) attributes {dimension_semantics = [#tpu.dimension_semantics<parallel>], iteration_bounds = array<i64: 2>, scalar_prefetch = 0 : i64, scratch_operands = 0 : i64, tpu.core_type = #tpu.core_type<tc>, window_params = [{transform_indices = @transform_0, window_bounds = array<i64: 4, 16, 4>}, {pipeline_mode = #tpu.pipeline_mode<synchronous>, transform_indices = @transform_1, window_bounds = array<i64: 3, 4, 8>}, {pipeline_mode = #tpu.pipeline_mode<synchronous>, transform_indices = @transform_2, window_bounds = array<i64: 3, 8, 8>}, {pipeline_mode = #tpu.pipeline_mode<synchronous>, transform_indices = @transform_3, window_bounds = array<i64: 4, 8>}, {pipeline_mode = #tpu.pipeline_mode<synchronous>, transform_indices = @transform_4, window_bounds = array<i64: 3, 8>}, {pipeline_mode = #tpu.pipeline_mode<synchronous>, transform_indices = @transform_5, window_bounds = array<i64: 3, 8, 8>}, {pipeline_mode = #tpu.pipeline_mode<synchronous>, transform_indices = @transform_6, window_bounds = array<i64: 3, 8, 8>}, {pipeline_mode = #tpu.pipeline_mode<synchronous>, transform_indices = @transform_7, window_bounds = array<i64: 2, 8>}, {pipeline_mode = #tpu.pipeline_mode<synchronous>, transform_indices = @transform_8, window_bounds = array<i64: 1, 8>}, {pipeline_mode = #tpu.pipeline_mode<synchronous>, transform_indices = @transform_9, window_bounds = array<i64: 1, 1>}, {transform_indices = @transform_10, window_bounds = array<i64: 1, 1, 4>}]} {
    %c0 = arith.constant 0 : index
    %c0_0 = arith.constant 0 : index
    %c0_1 = arith.constant 0 : index
    %0 = vector.load %arg1[%c0, %c0_0, %c0_1] : memref<4x16x4xf32, #tpu.memory_space<vmem>>, vector<4x16x4xf32>
    %c0_2 = arith.constant 0 : index
    %c0_3 = arith.constant 0 : index
    %1 = vector.load %arg5[%c0_2, %c0_3] : memref<3x8xf32, #tpu.memory_space<vmem>>, vector<1x8xf32>
    %cst = arith.constant 0.000000e+00 : f32
    %2 = vector.broadcast %cst : f32 to vector<4x2x4xf32>
    %3 = tpu.concatenate %2, %0 in 1 : vector<4x2x4xf32>, vector<4x16x4xf32> -> vector<4x18x4xf32>
    %4 = vector.extract_strided_slice %3 {offsets = [0, 0, 0], sizes = [4, 16, 4], strides = [1, 1, 1]} : vector<4x18x4xf32> to vector<4x16x4xf32>
    %5 = vector.shape_cast %4 : vector<4x16x4xf32> to vector<64x4xf32>
    %c0_4 = arith.constant 0 : index
    %c0_5 = arith.constant 0 : index
    %c0_6 = arith.constant 0 : index
    %6 = vector.load %arg2[%c0_4, %c0_5, %c0_6] : memref<3x4x8xf32, #tpu.memory_space<vmem>>, vector<1x4x8xf32>
    %7 = vector.shape_cast %6 : vector<1x4x8xf32> to vector<4x8xf32>
    %cst_7 = arith.constant dense<0.000000e+00> : vector<64x8xf32>
    %8 = tpu.matmul %5, %7, %cst_7 {dimension_numbers = #tpu.dot_dimension_numbers<[1], [0], [0], [1], [0, 0, 1, 1], [], []>} : vector<64x4xf32>, vector<4x8xf32>, vector<64x8xf32> -> vector<64x8xf32>
    %9 = vector.extract_strided_slice %3 {offsets = [0, 1, 0], sizes = [4, 16, 4], strides = [1, 1, 1]} : vector<4x18x4xf32> to vector<4x16x4xf32>
    %10 = vector.shape_cast %9 : vector<4x16x4xf32> to vector<64x4xf32>
    %c1 = arith.constant 1 : index
    %c0_8 = arith.constant 0 : index
    %c0_9 = arith.constant 0 : index
    %11 = vector.load %arg2[%c1, %c0_8, %c0_9] : memref<3x4x8xf32, #tpu.memory_space<vmem>>, vector<1x4x8xf32>
    %12 = vector.shape_cast %11 : vector<1x4x8xf32> to vector<4x8xf32>
    %cst_10 = arith.constant dense<0.000000e+00> : vector<64x8xf32>
    %13 = tpu.matmul %10, %12, %cst_10 {dimension_numbers = #tpu.dot_dimension_numbers<[1], [0], [0], [1], [0, 0, 1, 1], [], []>} : vector<64x4xf32>, vector<4x8xf32>, vector<64x8xf32> -> vector<64x8xf32>
    %14 = arith.addf %8, %13 : vector<64x8xf32>
    %15 = vector.extract_strided_slice %3 {offsets = [0, 2, 0], sizes = [4, 16, 4], strides = [1, 1, 1]} : vector<4x18x4xf32> to vector<4x16x4xf32>
    %16 = vector.shape_cast %15 : vector<4x16x4xf32> to vector<64x4xf32>
    %c2 = arith.constant 2 : index
    %c0_11 = arith.constant 0 : index
    %c0_12 = arith.constant 0 : index
    %17 = vector.load %arg2[%c2, %c0_11, %c0_12] : memref<3x4x8xf32, #tpu.memory_space<vmem>>, vector<1x4x8xf32>
    %18 = vector.shape_cast %17 : vector<1x4x8xf32> to vector<4x8xf32>
    %cst_13 = arith.constant dense<0.000000e+00> : vector<64x8xf32>
    %19 = tpu.matmul %16, %18, %cst_13 {dimension_numbers = #tpu.dot_dimension_numbers<[1], [0], [0], [1], [0, 0, 1, 1], [], []>} : vector<64x4xf32>, vector<4x8xf32>, vector<64x8xf32> -> vector<64x8xf32>
    %20 = arith.addf %14, %19 : vector<64x8xf32>
    %21 = vector.broadcast %1 : vector<1x8xf32> to vector<64x8xf32>
    %22 = arith.addf %20, %21 : vector<64x8xf32>
    %cst_14 = arith.constant 0.000000e+00 : f32
    %23 = vector.broadcast %cst_14 : f32 to vector<64x8xf32>
    %24 = arith.maximumf %22, %23 : vector<64x8xf32>
    %25 = vector.shape_cast %24 : vector<64x8xf32> to vector<4x16x8xf32>
    %c1_15 = arith.constant 1 : index
    %c0_16 = arith.constant 0 : index
    %26 = vector.load %arg5[%c1_15, %c0_16] : memref<3x8xf32, #tpu.memory_space<vmem>>, vector<1x8xf32>
    %cst_17 = arith.constant 0.000000e+00 : f32
    %27 = vector.broadcast %cst_17 : f32 to vector<4x2x8xf32>
    %28 = tpu.concatenate %27, %25 in 1 : vector<4x2x8xf32>, vector<4x16x8xf32> -> vector<4x18x8xf32>
    %29 = vector.extract_strided_slice %28 {offsets = [0, 0, 0], sizes = [4, 16, 8], strides = [1, 1, 1]} : vector<4x18x8xf32> to vector<4x16x8xf32>
    %30 = vector.shape_cast %29 : vector<4x16x8xf32> to vector<64x8xf32>
    %c0_18 = arith.constant 0 : index
    %c0_19 = arith.constant 0 : index
    %c0_20 = arith.constant 0 : index
    %31 = vector.load %arg3[%c0_18, %c0_19, %c0_20] : memref<3x8x8xf32, #tpu.memory_space<vmem>>, vector<1x8x8xf32>
    %32 = vector.shape_cast %31 : vector<1x8x8xf32> to vector<8x8xf32>
    %cst_21 = arith.constant dense<0.000000e+00> : vector<64x8xf32>
    %33 = tpu.matmul %30, %32, %cst_21 {dimension_numbers = #tpu.dot_dimension_numbers<[1], [0], [0], [1], [0, 0, 1, 1], [], []>} : vector<64x8xf32>, vector<8x8xf32>, vector<64x8xf32> -> vector<64x8xf32>
    %34 = vector.extract_strided_slice %28 {offsets = [0, 1, 0], sizes = [4, 16, 8], strides = [1, 1, 1]} : vector<4x18x8xf32> to vector<4x16x8xf32>
    %35 = vector.shape_cast %34 : vector<4x16x8xf32> to vector<64x8xf32>
    %c1_22 = arith.constant 1 : index
    %c0_23 = arith.constant 0 : index
    %c0_24 = arith.constant 0 : index
    %36 = vector.load %arg3[%c1_22, %c0_23, %c0_24] : memref<3x8x8xf32, #tpu.memory_space<vmem>>, vector<1x8x8xf32>
    %37 = vector.shape_cast %36 : vector<1x8x8xf32> to vector<8x8xf32>
    %cst_25 = arith.constant dense<0.000000e+00> : vector<64x8xf32>
    %38 = tpu.matmul %35, %37, %cst_25 {dimension_numbers = #tpu.dot_dimension_numbers<[1], [0], [0], [1], [0, 0, 1, 1], [], []>} : vector<64x8xf32>, vector<8x8xf32>, vector<64x8xf32> -> vector<64x8xf32>
    %39 = arith.addf %33, %38 : vector<64x8xf32>
    %40 = vector.extract_strided_slice %28 {offsets = [0, 2, 0], sizes = [4, 16, 8], strides = [1, 1, 1]} : vector<4x18x8xf32> to vector<4x16x8xf32>
    %41 = vector.shape_cast %40 : vector<4x16x8xf32> to vector<64x8xf32>
    %c2_26 = arith.constant 2 : index
    %c0_27 = arith.constant 0 : index
    %c0_28 = arith.constant 0 : index
    %42 = vector.load %arg3[%c2_26, %c0_27, %c0_28] : memref<3x8x8xf32, #tpu.memory_space<vmem>>, vector<1x8x8xf32>
    %43 = vector.shape_cast %42 : vector<1x8x8xf32> to vector<8x8xf32>
    %cst_29 = arith.constant dense<0.000000e+00> : vector<64x8xf32>
    %44 = tpu.matmul %41, %43, %cst_29 {dimension_numbers = #tpu.dot_dimension_numbers<[1], [0], [0], [1], [0, 0, 1, 1], [], []>} : vector<64x8xf32>, vector<8x8xf32>, vector<64x8xf32> -> vector<64x8xf32>
    %45 = arith.addf %39, %44 : vector<64x8xf32>
    %46 = vector.broadcast %26 : vector<1x8xf32> to vector<64x8xf32>
    %47 = arith.addf %45, %46 : vector<64x8xf32>
    %cst_30 = arith.constant 0.000000e+00 : f32
    %48 = vector.broadcast %cst_30 : f32 to vector<64x8xf32>
    %49 = arith.maximumf %47, %48 : vector<64x8xf32>
    %50 = vector.shape_cast %49 : vector<64x8xf32> to vector<4x16x8xf32>
    %51 = vector.shape_cast %0 : vector<4x16x4xf32> to vector<64x4xf32>
    %c0_31 = arith.constant 0 : index
    %c0_32 = arith.constant 0 : index
    %52 = vector.load %arg4[%c0_31, %c0_32] : memref<4x8xf32, #tpu.memory_space<vmem>>, vector<4x8xf32>
    %cst_33 = arith.constant dense<0.000000e+00> : vector<64x8xf32>
    %53 = tpu.matmul %51, %52, %cst_33 {dimension_numbers = #tpu.dot_dimension_numbers<[1], [0], [0], [1], [0, 0, 1, 1], [], []>} : vector<64x4xf32>, vector<4x8xf32>, vector<64x8xf32> -> vector<64x8xf32>
    %c2_34 = arith.constant 2 : index
    %c0_35 = arith.constant 0 : index
    %54 = vector.load %arg5[%c2_34, %c0_35] : memref<3x8xf32, #tpu.memory_space<vmem>>, vector<1x8xf32>
    %55 = vector.broadcast %54 : vector<1x8xf32> to vector<64x8xf32>
    %56 = arith.addf %53, %55 : vector<64x8xf32>
    %57 = vector.shape_cast %56 : vector<64x8xf32> to vector<4x16x8xf32>
    %58 = arith.addf %50, %57 : vector<4x16x8xf32>
    %cst_36 = arith.constant 0.000000e+00 : f32
    %59 = vector.broadcast %cst_36 : f32 to vector<4x16x8xf32>
    %60 = arith.maximumf %58, %59 : vector<4x16x8xf32>
    %c0_37 = arith.constant 0 : index
    %c0_38 = arith.constant 0 : index
    %61 = vector.load %arg8[%c0_37, %c0_38] : memref<2x8xf32, #tpu.memory_space<vmem>>, vector<1x8xf32>
    %cst_39 = arith.constant 0.000000e+00 : f32
    %62 = vector.broadcast %cst_39 : f32 to vector<4x4x8xf32>
    %63 = tpu.concatenate %62, %60 in 1 : vector<4x4x8xf32>, vector<4x16x8xf32> -> vector<4x20x8xf32>
    %64 = vector.extract_strided_slice %63 {offsets = [0, 0, 0], sizes = [4, 16, 8], strides = [1, 1, 1]} : vector<4x20x8xf32> to vector<4x16x8xf32>
    %65 = vector.shape_cast %64 : vector<4x16x8xf32> to vector<64x8xf32>
    %c0_40 = arith.constant 0 : index
    %c0_41 = arith.constant 0 : index
    %c0_42 = arith.constant 0 : index
    %66 = vector.load %arg6[%c0_40, %c0_41, %c0_42] : memref<3x8x8xf32, #tpu.memory_space<vmem>>, vector<1x8x8xf32>
    %67 = vector.shape_cast %66 : vector<1x8x8xf32> to vector<8x8xf32>
    %cst_43 = arith.constant dense<0.000000e+00> : vector<64x8xf32>
    %68 = tpu.matmul %65, %67, %cst_43 {dimension_numbers = #tpu.dot_dimension_numbers<[1], [0], [0], [1], [0, 0, 1, 1], [], []>} : vector<64x8xf32>, vector<8x8xf32>, vector<64x8xf32> -> vector<64x8xf32>
    %69 = vector.extract_strided_slice %63 {offsets = [0, 2, 0], sizes = [4, 16, 8], strides = [1, 1, 1]} : vector<4x20x8xf32> to vector<4x16x8xf32>
    %70 = vector.shape_cast %69 : vector<4x16x8xf32> to vector<64x8xf32>
    %c1_44 = arith.constant 1 : index
    %c0_45 = arith.constant 0 : index
    %c0_46 = arith.constant 0 : index
    %71 = vector.load %arg6[%c1_44, %c0_45, %c0_46] : memref<3x8x8xf32, #tpu.memory_space<vmem>>, vector<1x8x8xf32>
    %72 = vector.shape_cast %71 : vector<1x8x8xf32> to vector<8x8xf32>
    %cst_47 = arith.constant dense<0.000000e+00> : vector<64x8xf32>
    %73 = tpu.matmul %70, %72, %cst_47 {dimension_numbers = #tpu.dot_dimension_numbers<[1], [0], [0], [1], [0, 0, 1, 1], [], []>} : vector<64x8xf32>, vector<8x8xf32>, vector<64x8xf32> -> vector<64x8xf32>
    %74 = arith.addf %68, %73 : vector<64x8xf32>
    %75 = vector.extract_strided_slice %63 {offsets = [0, 4, 0], sizes = [4, 16, 8], strides = [1, 1, 1]} : vector<4x20x8xf32> to vector<4x16x8xf32>
    %76 = vector.shape_cast %75 : vector<4x16x8xf32> to vector<64x8xf32>
    %c2_48 = arith.constant 2 : index
    %c0_49 = arith.constant 0 : index
    %c0_50 = arith.constant 0 : index
    %77 = vector.load %arg6[%c2_48, %c0_49, %c0_50] : memref<3x8x8xf32, #tpu.memory_space<vmem>>, vector<1x8x8xf32>
    %78 = vector.shape_cast %77 : vector<1x8x8xf32> to vector<8x8xf32>
    %cst_51 = arith.constant dense<0.000000e+00> : vector<64x8xf32>
    %79 = tpu.matmul %76, %78, %cst_51 {dimension_numbers = #tpu.dot_dimension_numbers<[1], [0], [0], [1], [0, 0, 1, 1], [], []>} : vector<64x8xf32>, vector<8x8xf32>, vector<64x8xf32> -> vector<64x8xf32>
    %80 = arith.addf %74, %79 : vector<64x8xf32>
    %81 = vector.broadcast %61 : vector<1x8xf32> to vector<64x8xf32>
    %82 = arith.addf %80, %81 : vector<64x8xf32>
    %cst_52 = arith.constant 0.000000e+00 : f32
    %83 = vector.broadcast %cst_52 : f32 to vector<64x8xf32>
    %84 = arith.maximumf %82, %83 : vector<64x8xf32>
    %85 = vector.shape_cast %84 : vector<64x8xf32> to vector<4x16x8xf32>
    %c1_53 = arith.constant 1 : index
    %c0_54 = arith.constant 0 : index
    %86 = vector.load %arg8[%c1_53, %c0_54] : memref<2x8xf32, #tpu.memory_space<vmem>>, vector<1x8xf32>
    %87 = vector.extract_strided_slice %85 {offsets = [0, 4, 0], sizes = [4, 8, 8], strides = [1, 1, 1]} : vector<4x16x8xf32> to vector<4x8x8xf32>
    %88 = vector.shape_cast %87 : vector<4x8x8xf32> to vector<32x8xf32>
    %c0_55 = arith.constant 0 : index
    %c0_56 = arith.constant 0 : index
    %c0_57 = arith.constant 0 : index
    %89 = vector.load %arg7[%c0_55, %c0_56, %c0_57] : memref<3x8x8xf32, #tpu.memory_space<vmem>>, vector<1x8x8xf32>
    %90 = vector.shape_cast %89 : vector<1x8x8xf32> to vector<8x8xf32>
    %cst_58 = arith.constant dense<0.000000e+00> : vector<32x8xf32>
    %91 = tpu.matmul %88, %90, %cst_58 {dimension_numbers = #tpu.dot_dimension_numbers<[1], [0], [0], [1], [0, 0, 1, 1], [], []>} : vector<32x8xf32>, vector<8x8xf32>, vector<32x8xf32> -> vector<32x8xf32>
    %92 = vector.extract_strided_slice %85 {offsets = [0, 6, 0], sizes = [4, 8, 8], strides = [1, 1, 1]} : vector<4x16x8xf32> to vector<4x8x8xf32>
    %93 = vector.shape_cast %92 : vector<4x8x8xf32> to vector<32x8xf32>
    %c1_59 = arith.constant 1 : index
    %c0_60 = arith.constant 0 : index
    %c0_61 = arith.constant 0 : index
    %94 = vector.load %arg7[%c1_59, %c0_60, %c0_61] : memref<3x8x8xf32, #tpu.memory_space<vmem>>, vector<1x8x8xf32>
    %95 = vector.shape_cast %94 : vector<1x8x8xf32> to vector<8x8xf32>
    %cst_62 = arith.constant dense<0.000000e+00> : vector<32x8xf32>
    %96 = tpu.matmul %93, %95, %cst_62 {dimension_numbers = #tpu.dot_dimension_numbers<[1], [0], [0], [1], [0, 0, 1, 1], [], []>} : vector<32x8xf32>, vector<8x8xf32>, vector<32x8xf32> -> vector<32x8xf32>
    %97 = arith.addf %91, %96 : vector<32x8xf32>
    %98 = vector.extract_strided_slice %85 {offsets = [0, 8, 0], sizes = [4, 8, 8], strides = [1, 1, 1]} : vector<4x16x8xf32> to vector<4x8x8xf32>
    %99 = vector.shape_cast %98 : vector<4x8x8xf32> to vector<32x8xf32>
    %c2_63 = arith.constant 2 : index
    %c0_64 = arith.constant 0 : index
    %c0_65 = arith.constant 0 : index
    %100 = vector.load %arg7[%c2_63, %c0_64, %c0_65] : memref<3x8x8xf32, #tpu.memory_space<vmem>>, vector<1x8x8xf32>
    %101 = vector.shape_cast %100 : vector<1x8x8xf32> to vector<8x8xf32>
    %cst_66 = arith.constant dense<0.000000e+00> : vector<32x8xf32>
    %102 = tpu.matmul %99, %101, %cst_66 {dimension_numbers = #tpu.dot_dimension_numbers<[1], [0], [0], [1], [0, 0, 1, 1], [], []>} : vector<32x8xf32>, vector<8x8xf32>, vector<32x8xf32> -> vector<32x8xf32>
    %103 = arith.addf %97, %102 : vector<32x8xf32>
    %104 = vector.broadcast %86 : vector<1x8xf32> to vector<32x8xf32>
    %105 = arith.addf %103, %104 : vector<32x8xf32>
    %cst_67 = arith.constant 0.000000e+00 : f32
    %106 = vector.broadcast %cst_67 : f32 to vector<32x8xf32>
    %107 = arith.maximumf %105, %106 : vector<32x8xf32>
    %108 = vector.shape_cast %107 : vector<32x8xf32> to vector<4x8x8xf32>
    %109 = vector.extract_strided_slice %60 {offsets = [0, 8, 0], sizes = [4, 8, 8], strides = [1, 1, 1]} : vector<4x16x8xf32> to vector<4x8x8xf32>
    %110 = arith.addf %108, %109 : vector<4x8x8xf32>
    %cst_68 = arith.constant 0.000000e+00 : f32
    %111 = vector.broadcast %cst_68 : f32 to vector<4x8x8xf32>
    %112 = arith.maximumf %110, %111 : vector<4x8x8xf32>
    %c0_69 = arith.constant 0 : index
    %c0_70 = arith.constant 0 : index
    %113 = vector.load %arg9[%c0_69, %c0_70] : memref<1x8xf32, #tpu.memory_space<vmem>>, vector<1x8xf32>
    %c0_71 = arith.constant 0 : index
    %c0_72 = arith.constant 0 : index
    %114 = vector.load %arg10[%c0_71, %c0_72] : memref<1x1xf32, #tpu.memory_space<vmem>>, vector<1x1xf32>
    %115 = vector.extract_strided_slice %112 {offsets = [0, 7, 0], sizes = [4, 1, 8], strides = [1, 1, 1]} : vector<4x8x8xf32> to vector<4x1x8xf32>
    %116 = vector.shape_cast %115 : vector<4x1x8xf32> to vector<4x8xf32>
    %117 = tpu.transpose %116, [1, 0] : vector<4x8xf32> -> vector<8x4xf32>
    %cst_73 = arith.constant dense<0.000000e+00> : vector<1x4xf32>
    %118 = tpu.matmul %113, %117, %cst_73 {dimension_numbers = #tpu.dot_dimension_numbers<[1], [0], [0], [1], [0, 0, 1, 1], [], []>} : vector<1x8xf32>, vector<8x4xf32>, vector<1x4xf32> -> vector<1x4xf32>
    %119 = vector.broadcast %114 : vector<1x1xf32> to vector<1x4xf32>
    %120 = arith.addf %118, %119 : vector<1x4xf32>
    %121 = vector.shape_cast %120 : vector<1x4xf32> to vector<1x1x4xf32>
    %c0_74 = arith.constant 0 : index
    %c0_75 = arith.constant 0 : index
    %c0_76 = arith.constant 0 : index
    %122 = vector.load %arg11[%c0_74, %c0_75, %c0_76] : memref<1x1x4xf32, #tpu.memory_space<vmem>>, vector<1x1x4xf32>
    tpu.vector_store %arg11[%c0_74, %c0_75, %c0_76], %121 {strides = array<i32>} : memref<1x1x4xf32, #tpu.memory_space<vmem>>, vector<1x1x4xf32>,
    return
  }
  func.func @transform_0(%arg0: i32) -> (i32, i32, i32) {
    %c0_i32 = arith.constant 0 : i32
    %c0_i32_0 = arith.constant 0 : i32
    %c0_i32_1 = arith.constant 0 : i32
    return %arg0, %c0_i32, %c0_i32_0 : i32, i32, i32
  }
  func.func @transform_1(%arg0: i32) -> (i32, i32, i32) {
    %c0_i32 = arith.constant 0 : i32
    %c0_i32_0 = arith.constant 0 : i32
    %c0_i32_1 = arith.constant 0 : i32
    %c0_i32_2 = arith.constant 0 : i32
    return %c0_i32, %c0_i32_0, %c0_i32_1 : i32, i32, i32
  }
  func.func @transform_2(%arg0: i32) -> (i32, i32, i32) {
    %c0_i32 = arith.constant 0 : i32
    %c0_i32_0 = arith.constant 0 : i32
    %c0_i32_1 = arith.constant 0 : i32
    %c0_i32_2 = arith.constant 0 : i32
    return %c0_i32, %c0_i32_0, %c0_i32_1 : i32, i32, i32
  }
  func.func @transform_3(%arg0: i32) -> (i32, i32) {
    %c0_i32 = arith.constant 0 : i32
    %c0_i32_0 = arith.constant 0 : i32
    %c0_i32_1 = arith.constant 0 : i32
    return %c0_i32, %c0_i32_0 : i32, i32
  }
  func.func @transform_4(%arg0: i32) -> (i32, i32) {
    %c0_i32 = arith.constant 0 : i32
    %c0_i32_0 = arith.constant 0 : i32
    %c0_i32_1 = arith.constant 0 : i32
    return %c0_i32, %c0_i32_0 : i32, i32
  }
  func.func @transform_5(%arg0: i32) -> (i32, i32, i32) {
    %c0_i32 = arith.constant 0 : i32
    %c0_i32_0 = arith.constant 0 : i32
    %c0_i32_1 = arith.constant 0 : i32
    %c0_i32_2 = arith.constant 0 : i32
    return %c0_i32, %c0_i32_0, %c0_i32_1 : i32, i32, i32
  }
  func.func @transform_6(%arg0: i32) -> (i32, i32, i32) {
    %c0_i32 = arith.constant 0 : i32
    %c0_i32_0 = arith.constant 0 : i32
    %c0_i32_1 = arith.constant 0 : i32
    %c0_i32_2 = arith.constant 0 : i32
    return %c0_i32, %c0_i32_0, %c0_i32_1 : i32, i32, i32
  }
  func.func @transform_7(%arg0: i32) -> (i32, i32) {
    %c0_i32 = arith.constant 0 : i32
    %c0_i32_0 = arith.constant 0 : i32
    %c0_i32_1 = arith.constant 0 : i32
    return %c0_i32, %c0_i32_0 : i32, i32
  }
  func.func @transform_8(%arg0: i32) -> (i32, i32) {
    %c0_i32 = arith.constant 0 : i32
    %c0_i32_0 = arith.constant 0 : i32
    %c0_i32_1 = arith.constant 0 : i32
    return %c0_i32, %c0_i32_0 : i32, i32
  }
  func.func @transform_9(%arg0: i32) -> (i32, i32) {
    %c0_i32 = arith.constant 0 : i32
    %c0_i32_0 = arith.constant 0 : i32
    %c0_i32_1 = arith.constant 0 : i32
    return %c0_i32, %c0_i32_0 : i32, i32
  }
  func.func @transform_10(%arg0: i32) -> (i32, i32, i32) {
    %c0_i32 = arith.constant 0 : i32
    %c0_i32_0 = arith.constant 0 : i32
    %c0_i32_1 = arith.constant 0 : i32
    return %arg0, %c0_i32, %c0_i32_0 : i32, i32, i32
  }
}

</mosaic_0001>

<bundles_post_ra>
// kernel: tcn_forward.1
= control target key start
LH: loop header
LB: loop body
LE: loop exit
PB: predicated region body
PF: predicated region fallthrough
CT: control target
= control target key end

     0   :  { %s1752_s15 = smov 0   ;;  %s2116_s0 = inlined_call_operand.vmem [shape: f32[8,16,4], index: 0, kind: input, shape index: {}]   ;;  %s2117_s1 = inlined_call_operand.vmem [shape: f32[3,4,8], index: 1, kind: input, shape index: {}]   ;;  %s2118_s2 = inlined_call_operand.vmem [shape: f32[3,8,8], index: 2, kind: input, shape index: {}]   ;;  %s2119_s3 = inlined_call_operand.vmem [shape: f32[4,8], index: 3, kind: input, shape index: {}]   ;;  %s2120_s4 = inlined_call_operand.vmem [shape: f32[3,8], index: 4, kind: input, shape index: {}]   ;;  %s2121_s5 = inlined_call_operand.vmem [shape: f32[3,8,8], index: 5, kind: input, shape index: {}]   ;;  %s2122_s6 = inlined_call_operand.vmem [shape: f32[3,8,8], index: 6, kind: input, shape index: {}]   ;;  %s2123_s7 = inlined_call_operand.vmem [shape: f32[2,8], index: 7, kind: input, shape index: {}]   ;;  %s2124_s8 = inlined_call_operand.vmem [shape: f32[1,8], index: 8, kind: input, shape index: {}]   ;;  %s2125_s9 = inlined_call_operand.<no memory space> [shape: f32[1,1], index: 9, kind: input, shape index: {}]   ;;  %s2126_s10 = inlined_call_operand.vmem [shape: f32[2,1,4], index: 10, kind: output, shape index: {}]  }
   0x1   :  { %v15_v0 = vstv %s2125_s9 }
   0x2   :  { %16 = vst [vmem:[#allocation2] sm:$0x1] %v15_v0 }
   0x3 LB: > { %s1758_s16 = sadd.s32 4294967295, %s1691_s15   ;;  %p1557_p0 = scmp.ge.s32.totalorder %s1691_s15, 1  ;;  %s1691_s15 = sphi %s1752_s15, %s22_s15  }
   0x4   : > { %p316_p1 = scmp.lt.s32.totalorder %s1691_s15, 3 }
   0x6   : > { %p317_p2 = pnand %p1557_p0, %p316_p1 }
   0x7   : > { %s1558_s18 = sshll.u32 (!%p317_p2), %s1758_s16, 2  ;;  %p360_p4 = scmp.lt.s32.totalorder (!%p317_p2), %s1758_s16, 1 }
   0x8   : > { %320 = sbr.rel (%p317_p2) target bundleno = 847 (0x34f), region = 60  ;;  %p354_p3 = scmp.lt.s32.totalorder (!%p317_p2), %s1558_s18, 7 }
   0xd   : > { %vm446_vm0 = vcmask 1043456   ;;  %v1580_v1 = vld [vmem:[%s2117_s1 + $0x8] sm:$0xf]  ;;  %v1561_v2 = vld [vmem:[%s2117_s1 + $0x4] sm:$0xf]  ;;  %s2128_s18 = smov (!%p354_p3, %s1558_s18), 7 }
   0xe   : > { %1581 = vmatpush.msk.msra.mxu2 %vm446_vm0, %v1580_v1  ;;  %v401_v3 = vld [vmem:[%s2117_s1] sm:$0xf]  ;;  %1562 = vmatpush.msk.msra.mxu0 %vm446_vm0, %v1561_v2  ;;  %s1669_s23 = sshll.u32 %s2128_s18, 4  ;;  %vm380_vm1 = vcmask 1041408   ;;  %vm429_vm2 = vcmask 31744   ;;  %vm551_vm3 = vcmask 1045504  }
   0xf   : > { %1571 = vmatpush.msk.msra.mxu1 %vm446_vm0, %v401_v3  ;;  %s1778_s26 = scalar_lea.vmem %s2116_s0, %s1669_s23  ;;  %vm406_vm4 = vcmask 1046528   ;;  %v688_v42 = vld [vmem:[%s2118_s2] sm:$0xff]  ;;  %v1607_v44 = vld [vmem:[%s2118_s2 + $0x10] sm:$0xff]  ;;  %vm715_vm5 = vcmask 64512   ;;  %vm1471_vm6 = vcmask 1041409   ;;  %vm1474_vm7 = vcmask 1042434  }
  0x10   : > { %v1781_v4 = vld [vmem:[%s1778_s26] sm:$0xff]  ;;  %v1784_v5 = vld [vmem:[%s1778_s26 + $0x8] sm:$0xff]  ;;  %v1794_v16 = vld [vmem:[%s1778_s26 + $0x10] sm:$0xff]  ;;  %804 = vmatpush.msrb.mxu0 %v688_v42  ;;  %vm1477_vm8 = vcmask 1043459   ;;  %s2130_s16 = smov (!%p360_p4, %s1758_s16), 1  ;;  %vm1504_vm9 = vcmask 24576  }
  0x11   : > { %v381_v6 = vrot.slane %v1781_v4, 6  ;;  %v382_v7 = vrot.slane %v1784_v5, 6  ;;  %v1797_v17 = vld [vmem:[%s1778_s26 + $0x18] sm:$0xff]  ;;  %v384_v20 = vrot.slane %v1794_v16, 6  ;;  %v1814_v32 = vld [vmem:[%s1778_s26 + $0x20] sm:$0xff]  ;;  %v1817_v33 = vld [vmem:[%s1778_s26 + $0x28] sm:$0xff]  ;;  %883 = vmatpush.msrb.mxu1 %v1607_v44  ;;  %s362_s23 = scalar_lea.vmem %s2126_s10, %s2130_s16 }
  0x12   : > { %v385_v21 = vrot.slane %v1797_v17, 6  ;;  %v387_v36 = vrot.slane %v1814_v32, 6  ;;  %v388_v37 = vrot.slane %v1817_v33, 6  ;;  %v934_v43 = vld [vmem:[%s2119_s3] sm:$0xf]  ;;  %v369_v51 = vld [vmem:[%s1778_s26 + $0x30] sm:$0xff] }
  0x13   : > { %v383_v8 = vsel %vm380_vm1, %v381_v6, %v382_v7  ;;  %v397_v9 = vsel %vm380_vm1, 0.0, %v381_v6  ;;  %v555_v18 = vrot.slane %v382_v7, 2  ;;  %v410_v19 = vrot.slane %v382_v7, 1  ;;  %1616 = vmatpush.msk.msrb.mxu2 %vm446_vm0, %v934_v43  ;;  %v370_v52 = vld [vmem:[%s1778_s26 + $0x38] sm:$0xff] }
  0x14   : > { %v552_v10 = vrot.slane %v397_v9, 2  ;;  %v553_v11 = vrot.slane %v383_v8, 2  ;;  %v407_v12 = vrot.slane %v397_v9, 1  ;;  %v408_v13 = vrot.slane %v383_v8, 1  ;;  %1572 = vmatmul.msk.f32.vlgmr.msra.gmra.mxu1 %vm429_vm2, %v397_v9 }
  0x15   : > { %v386_v24 = vsel %vm380_vm1, %v384_v20, %v385_v21  ;;  %v398_v25 = vsel %vm380_vm1, 0.0, %v384_v20  ;;  %v560_v34 = vrot.slane %v385_v21, 2  ;;  %v415_v35 = vrot.slane %v385_v21, 1 }
  0x16   : > { %v554_v14 = vsel %vm551_vm3, %v552_v10, %v553_v11  ;;  %v409_v15 = vsel %vm406_vm4, %v407_v12, %v408_v13  ;;  %v556_v22 = vsel %vm551_vm3, %v553_v11, %v555_v18  ;;  %v411_v23 = vsel %vm406_vm4, %v408_v13, %v410_v19  ;;  %v1884_v11 = vld [vmem:[%s2120_s4] ss:$0 sm:$0xff] }
  0x17   : > { %1582 = vmatmul.msk.f32.vlgmr.msra.gmra.mxu2 %vm429_vm2, %v554_v14  ;;  %1563 = vmatmul.msk.f32.vlgmr.msra.gmra.mxu0 %vm429_vm2, %v409_v15  ;;  %v557_v26 = vrot.slane %v398_v25, 2  ;;  %v558_v27 = vrot.slane %v386_v24, 2  ;;  %v412_v28 = vrot.slane %v398_v25, 1  ;;  %v413_v29 = vrot.slane %v386_v24, 1 }
  0x18   : > { %v389_v40 = vsel %vm380_vm1, %v387_v36, %v388_v37  ;;  %v399_v41 = vsel %vm380_vm1, 0.0, %v387_v36  ;;  %v565_v53 = vrot.slane %v388_v37, 2  ;;  %v420_v54 = vrot.slane %v388_v37, 1 }
  0x19   : > { %v559_v30 = vsel %vm551_vm3, %v557_v26, %v558_v27  ;;  %v414_v31 = vsel %vm406_vm4, %v412_v28, %v413_v29  ;;  %v561_v38 = vsel %vm551_vm3, %v558_v27, %v560_v34  ;;  %v416_v39 = vsel %vm406_vm4, %v413_v29, %v415_v35 }
  0x1a   : > { %v562_v45 = vrot.slane %v399_v41, 2  ;;  %v563_v46 = vrot.slane %v389_v40, 2  ;;  %v417_v47 = vrot.slane %v399_v41, 1  ;;  %v418_v48 = vrot.slane %v389_v40, 1 }
  0x1b   : > { %v390_v55 = vrot.slane %v369_v51, 6  ;;  %v391_v56 = vrot.slane %v370_v52, 6 }
  0x1c   : > { %1573 = vmatmul.msk.f32.gmra.mxu1 %vm429_vm2, %v383_v8  ;;  %v564_v49 = vsel %vm551_vm3, %v562_v45, %v563_v46  ;;  %v419_v50 = vsel %vm406_vm4, %v417_v47, %v418_v48  ;;  %v566_v57 = vsel %vm551_vm3, %v563_v46, %v565_v53  ;;  %v421_v58 = vsel %vm406_vm4, %v418_v48, %v420_v54 }
  0x1d   : > { %v392_v59 = vsel %vm380_vm1, %v390_v55, %v391_v56  ;;  %v400_v60 = vsel %vm380_vm1, 0.0, %v390_v55  ;;  %v570_v3 = vrot.slane %v391_v56, 2  ;;  %v425_v6 = vrot.slane %v391_v56, 1 }
  0x1e   : > { %v567_v61 = vrot.slane %v400_v60, 2  ;;  %v568_v62 = vrot.slane %v392_v59, 2  ;;  %v422_v63 = vrot.slane %v400_v60, 1  ;;  %v423_v0 = vrot.slane %v392_v59, 1 }
  0x1f   : > { %1583 = vmatmul.msk.f32.gmra.mxu2 %vm429_vm2, %v556_v22  ;;  %1564 = vmatmul.msk.f32.gmra.mxu0 %vm429_vm2, %v411_v23 }
  0x20   : > { %v569_v1 = vsel %vm551_vm3, %v567_v61, %v568_v62  ;;  %v424_v2 = vsel %vm406_vm4, %v422_v63, %v423_v0  ;;  %v571_v7 = vsel %vm551_vm3, %v568_v62, %v570_v3  ;;  %v426_v8 = vsel %vm406_vm4, %v423_v0, %v425_v6 }
  0x24   : > { %1574 = vmatmul.msk.f32.gmra.mxu1 %vm429_vm2, %v398_v25 }
  0x27   : > { %1584 = vmatmul.msk.f32.gmra.mxu2 %vm429_vm2, %v559_v30  ;;  %1565 = vmatmul.msk.f32.gmra.mxu0 %vm429_vm2, %v414_v31 }
  0x2c   : > { %1575 = vmatmul.msk.f32.gmra.mxu1 %vm429_vm2, %v386_v24 }
  0x2f   : > { %1585 = vmatmul.msk.f32.gmra.mxu2 %vm429_vm2, %v561_v38  ;;  %1566 = vmatmul.msk.f32.gmra.mxu0 %vm429_vm2, %v416_v39 }
  0x34   : > { %1576 = vmatmul.msk.f32.gmra.mxu1 %vm429_vm2, %v399_v41 }
  0x37   : > { %1586 = vmatmul.msk.f32.gmra.mxu2 %vm429_vm2, %v564_v49  ;;  %1567 = vmatmul.msk.f32.gmra.mxu0 %vm429_vm2, %v419_v50 }
  0x3c   : > { %1577 = vmatmul.msk.f32.gmra.mxu1 %vm429_vm2, %v389_v40 }
  0x3f   : > { %1587 = vmatmul.msk.f32.gmra.mxu2 %vm429_vm2, %v566_v57  ;;  %1568 = vmatmul.msk.f32.gmra.mxu0 %vm429_vm2, %v421_v58 }
  0x44   : > { %1578 = vmatmul.msk.f32.gmra.mxu1 %vm429_vm2, %v400_v60 }
  0x47   : > { %1588 = vmatmul.msk.f32.gmra.mxu2 %vm429_vm2, %v569_v1  ;;  %1569 = vmatmul.msk.f32.gmra.mxu0 %vm429_vm2, %v424_v2 }
  0x4c   : > { %1579 = vmatmul.msk.f32.gmra.mxu1 %vm429_vm2, %v392_v59 }
  0x4f   : > { %1589 = vmatmul.msk.f32.gmra.mxu2 %vm429_vm2, %v571_v7  ;;  %1570 = vmatmul.msk.f32.gmra.mxu0 %vm429_vm2, %v426_v8 }
  0x57   : > { %1617 = vmatmul.msk.f32.vlgmr.msrb.gmra.mxu2 %vm429_vm2, %v1781_v4  ;;  %v1590_v4 = vld [vmem:[%s2118_s2 + $0x8] sm:$0xff] }
  0x58   : > { %747 = vmatpush.msra.mxu3 %v1590_v4 }
  0x5f   : > { %1618 = vmatmul.msk.f32.gmra.mxu2 %vm429_vm2, %v1784_v5 }
  0x67   : > { %1619 = vmatmul.msk.f32.gmra.mxu2 %vm429_vm2, %v1794_v16 }
  0x6f   : > { %1620 = vmatmul.msk.f32.gmra.mxu2 %vm429_vm2, %v1797_v17 }
  0x77   : > { %1621 = vmatmul.msk.f32.gmra.mxu2 %vm429_vm2, %v1814_v32 }
  0x7f   : > { %1622 = vmatmul.msk.f32.gmra.mxu2 %vm429_vm2, %v1817_v33 }
  0x87   : > { %1623 = vmatmul.msk.f32.gmra.mxu2 %vm429_vm2, %v369_v51 }
  0x8f   : > { %1624 = vmatmul.msk.f32.gmra.mxu2 %vm429_vm2, %v370_v52 }
  0x91   : > { %v527_v5 = vpop.f32.mrf.mxu1 }
  0x94   : > { %v467_v9 = vpop.f32.mrf.mxu0 }
  0x95   : > { %v528_v10 = vadd.f32 %v527_v5, %v467_v9 }
  0x99   : > { %v530_v12 = vpop.f32.mrf.mxu1 }
  0x9a   : > { %v610_v13 = vpop.f32.mrf.mxu2 }
  0x9b   : > { %v634_v14 = vadd.f32 %v610_v13, %v528_v10 }
  0x9c   : > { %v470_v15 = vpop.f32.mrf.mxu0 }
  0x9d   : > { %v643_v16 = vadd.f32 %v1884_v11, %v634_v14  ;;  %v531_v18 = vadd.f32 %v530_v12, %v470_v15 }
  0x9f   : > { %v651_v17 = vmax.f32 %v643_v16, 0.0 }
  0xa1   : > { %v668_v19 = vrot.slane %v651_v17, 6  ;;  %v533_v20 = vpop.f32.mrf.mxu1 }
  0xa2   : > { %v613_v21 = vpop.f32.mrf.mxu2 }
  0xa3   : > { %v635_v22 = vadd.f32 %v613_v21, %v531_v18  ;;  %v684_v23 = vsel %vm380_vm1, 0.0, %v668_v19 }
  0xa4   : > { %1599 = vmatmul.msk.f32.vlgmr.msrb.gmra.mxu0 %vm715_vm5, %v684_v23  ;;  %v473_v24 = vpop.f32.mrf.mxu0  ;;  %v693_v33 = vrot.slane %v684_v23, 1  ;;  %v830_v34 = vrot.slane %v684_v23, 2 }
  0xa5   : > { %v644_v25 = vadd.f32 %v1884_v11, %v635_v22  ;;  %v534_v27 = vadd.f32 %v533_v20, %v473_v24 }
  0xa7   : > { %v652_v26 = vmax.f32 %v644_v25, 0.0 }
  0xa9   : > { %v669_v28 = vrot.slane %v652_v26, 6  ;;  %v536_v29 = vpop.f32.mrf.mxu1 }
  0xaa   : > { %v616_v30 = vpop.f32.mrf.mxu2 }
  0xab   : > { %v636_v31 = vadd.f32 %v616_v30, %v534_v27  ;;  %v670_v32 = vsel %vm380_vm1, %v668_v19, %v669_v28  ;;  %v696_v46 = vrot.slane %v669_v28, 1  ;;  %v833_v47 = vrot.slane %v669_v28, 2 }
  0xac   : > { %v694_v35 = vrot.slane %v670_v32, 1  ;;  %1600 = vmatmul.msk.f32.gmra.mxu0 %vm715_vm5, %v670_v32  ;;  %v831_v36 = vrot.slane %v670_v32, 2  ;;  %v476_v37 = vpop.f32.mrf.mxu0 }
  0xad   : > { %v645_v38 = vadd.f32 %v1884_v11, %v636_v31  ;;  %v537_v42 = vadd.f32 %v536_v29, %v476_v37 }
  0xae   : > { %v695_v39 = vsel %vm406_vm4, %v693_v33, %v694_v35  ;;  %v832_v40 = vsel %vm551_vm3, %v830_v34, %v831_v36  ;;  %v697_v52 = vsel %vm406_vm4, %v694_v35, %v696_v46  ;;  %v834_v53 = vsel %vm551_vm3, %v831_v36, %v833_v47 }
  0xaf   : > { %v653_v41 = vmax.f32 %v645_v38, 0.0  ;;  %1591 = vmatmul.msk.f32.vlgmr.msra.gmra.mxu3 %vm715_vm5, %v695_v39  ;;  %1608 = vmatmul.msk.f32.vlgmr.msrb.gmra.mxu1 %vm715_vm5, %v832_v40 }
  0xb1   : > { %v671_v43 = vrot.slane %v653_v41, 6  ;;  %v539_v44 = vpop.f32.mrf.mxu1 }
  0xb2   : > { %v619_v45 = vpop.f32.mrf.mxu2 }
  0xb3   : > { %v637_v48 = vadd.f32 %v619_v45, %v537_v42  ;;  %v685_v49 = vsel %vm380_vm1, 0.0, %v671_v43 }
  0xb4   : > { %1601 = vmatmul.msk.f32.gmra.mxu0 %vm715_vm5, %v685_v49  ;;  %v479_v50 = vpop.f32.mrf.mxu0  ;;  %v698_v61 = vrot.slane %v685_v49, 1  ;;  %v835_v62 = vrot.slane %v685_v49, 2 }
  0xb5   : > { %v646_v51 = vadd.f32 %v1884_v11, %v637_v48  ;;  %v540_v55 = vadd.f32 %v539_v44, %v479_v50 }
  0xb7   : > { %v654_v54 = vmax.f32 %v646_v51, 0.0  ;;  %1592 = vmatmul.msk.f32.gmra.mxu3 %vm715_vm5, %v697_v52  ;;  %1609 = vmatmul.msk.f32.gmra.mxu1 %vm715_vm5, %v834_v53 }
  0xb9   : > { %v672_v56 = vrot.slane %v654_v54, 6  ;;  %v542_v57 = vpop.f32.mrf.mxu1 }
  0xba   : > { %v622_v58 = vpop.f32.mrf.mxu2 }
  0xbb   : > { %v638_v59 = vadd.f32 %v622_v58, %v540_v55  ;;  %v673_v60 = vsel %vm380_vm1, %v671_v43, %v672_v56  ;;  %v701_v9 = vrot.slane %v672_v56, 1  ;;  %v838_v10 = vrot.slane %v672_v56, 2  ;;  %v1042_v58 = vld [vmem:[%s2121_s5] sm:$0xff] }
  0xbc   : > { %v699_v63 = vrot.slane %v673_v60, 1  ;;  %1602 = vmatmul.msk.f32.gmra.mxu0 %vm715_vm5, %v673_v60  ;;  %v836_v0 = vrot.slane %v673_v60, 2  ;;  %v482_v1 = vpop.f32.mrf.mxu0 }
  0xbd   : > { %v647_v2 = vadd.f32 %v1884_v11, %v638_v59  ;;  %v543_v8 = vadd.f32 %v542_v57, %v482_v1  ;;  %v1625_v57 = vld [vmem:[%s2121_s5 + $0x8] sm:$0xff]  ;;  %1157 = vmatpush.msra.mxu0 %v1042_v58  ;;  %v1642_v59 = vld [vmem:[%s2121_s5 + $0x10] sm:$0xff] }
  0xbe   : > { %v700_v3 = vsel %vm406_vm4, %v698_v61, %v699_v63  ;;  %v837_v6 = vsel %vm551_vm3, %v835_v62, %v836_v0  ;;  %v702_v17 = vsel %vm406_vm4, %v699_v63, %v701_v9  ;;  %v839_v18 = vsel %vm551_vm3, %v836_v0, %v838_v10  ;;  %1100 = vmatpush.msrb.mxu3 %v1625_v57 }
  0xbf   : > { %v655_v7 = vmax.f32 %v647_v2, 0.0  ;;  %1593 = vmatmul.msk.f32.gmra.mxu3 %vm715_vm5, %v700_v3  ;;  %1610 = vmatmul.msk.f32.gmra.mxu1 %vm715_vm5, %v837_v6  ;;  %v1954_v3 = vld [vmem:[%s2120_s4 + $0x1] ss:$0 sm:$0xff]  ;;  %v1959_v6 = vld [vmem:[%s2120_s4 + $0x2] ss:$0 sm:$0xff] }
  0xc0   : > { %1236 = vmatpush.msra.mxu1 %v1642_v59 }
  0xc1   : > { %v674_v4 = vrot.slane %v655_v7, 6  ;;  %v545_v12 = vpop.f32.mrf.mxu1 }
  0xc2   : > { %v625_v5 = vpop.f32.mrf.mxu2 }
  0xc3   : > { %v639_v13 = vadd.f32 %v625_v5, %v543_v8  ;;  %v686_v14 = vsel %vm380_vm1, 0.0, %v674_v4 }
  0xc4   : > { %1603 = vmatmul.msk.f32.gmra.mxu0 %vm715_vm5, %v686_v14  ;;  %v485_v15 = vpop.f32.mrf.mxu0  ;;  %v703_v25 = vrot.slane %v686_v14, 1  ;;  %v840_v26 = vrot.slane %v686_v14, 2 }
  0xc5   : > { %v648_v16 = vadd.f32 %v1884_v11, %v639_v13  ;;  %v546_v20 = vadd.f32 %v545_v12, %v485_v15 }
  0xc7   : > { %v656_v19 = vmax.f32 %v648_v16, 0.0  ;;  %1594 = vmatmul.msk.f32.gmra.mxu3 %vm715_vm5, %v702_v17  ;;  %1611 = vmatmul.msk.f32.gmra.mxu1 %vm715_vm5, %v839_v18 }
  0xc9   : > { %v675_v21 = vrot.slane %v656_v19, 6  ;;  %v548_v30 = vpop.f32.mrf.mxu1 }
  0xca   : > { %v628_v22 = vpop.f32.mrf.mxu2 }
  0xcb   : > { %v640_v23 = vadd.f32 %v628_v22, %v546_v20  ;;  %v676_v24 = vsel %vm380_vm1, %v674_v4, %v675_v21  ;;  %v706_v38 = vrot.slane %v675_v21, 1  ;;  %v843_v39 = vrot.slane %v675_v21, 2 }
  0xcc   : > { %v704_v27 = vrot.slane %v676_v24, 1  ;;  %1604 = vmatmul.msk.f32.gmra.mxu0 %vm715_vm5, %v676_v24  ;;  %v841_v28 = vrot.slane %v676_v24, 2  ;;  %v488_v29 = vpop.f32.mrf.mxu0 }
  0xcd   : > { %v649_v31 = vadd.f32 %v1884_v11, %v640_v23  ;;  %v549_v35 = vadd.f32 %v548_v30, %v488_v29 }
  0xce   : > { %v705_v32 = vsel %vm406_vm4, %v703_v25, %v704_v27  ;;  %v842_v33 = vsel %vm551_vm3, %v840_v26, %v841_v28  ;;  %v707_v43 = vsel %vm406_vm4, %v704_v27, %v706_v38  ;;  %v844_v44 = vsel %vm551_vm3, %v841_v28, %v843_v39 }
  0xcf   : > { %v657_v34 = vmax.f32 %v649_v31, 0.0  ;;  %1595 = vmatmul.msk.f32.gmra.mxu3 %vm715_vm5, %v705_v32  ;;  %1612 = vmatmul.msk.f32.gmra.mxu1 %vm715_vm5, %v842_v33 }
  0xd1   : > { %v677_v36 = vrot.slane %v657_v34, 6 }
  0xd2   : > { %v631_v37 = vpop.f32.mrf.mxu2 }
  0xd3   : > { %v641_v40 = vadd.f32 %v631_v37, %v549_v35  ;;  %v687_v41 = vsel %vm380_vm1, 0.0, %v677_v36 }
  0xd4   : > { %1605 = vmatmul.msk.f32.gmra.mxu0 %vm715_vm5, %v687_v41  ;;  %v708_v48 = vrot.slane %v687_v41, 1  ;;  %v845_v49 = vrot.slane %v687_v41, 2 }
  0xd5   : > { %v650_v42 = vadd.f32 %v1884_v11, %v641_v40 }
  0xd7   : > { %v658_v45 = vmax.f32 %v650_v42, 0.0  ;;  %1596 = vmatmul.msk.f32.gmra.mxu3 %vm715_vm5, %v707_v43  ;;  %1613 = vmatmul.msk.f32.gmra.mxu1 %vm715_vm5, %v844_v44 }
  0xd9   : > { %v678_v46 = vrot.slane %v658_v45, 6 }
  0xda   : > { %v973_v61 = vpop.f32.mrf.mxu2 }
  0xdb   : > { %v679_v47 = vsel %vm380_vm1, %v677_v36, %v678_v46  ;;  %v711_v53 = vrot.slane %v678_v46, 1  ;;  %v848_v54 = vrot.slane %v678_v46, 2  ;;  %v974_v5 = vadd.f32 %v1959_v6, %v973_v61 }
  0xdc   : > { %v709_v50 = vrot.slane %v679_v47, 1  ;;  %1606 = vmatmul.msk.f32.gmra.mxu0 %vm715_vm5, %v679_v47  ;;  %v846_v51 = vrot.slane %v679_v47, 2 }
  0xde   : > { %v710_v11 = vsel %vm406_vm4, %v708_v48, %v709_v50  ;;  %v847_v52 = vsel %vm551_vm3, %v845_v49, %v846_v51  ;;  %v712_v55 = vsel %vm406_vm4, %v709_v50, %v711_v53  ;;  %v849_v56 = vsel %vm551_vm3, %v846_v51, %v848_v54 }
  0xdf   : > { %1597 = vmatmul.msk.f32.gmra.mxu3 %vm715_vm5, %v710_v11  ;;  %1614 = vmatmul.msk.f32.gmra.mxu1 %vm715_vm5, %v847_v52 }
  0xe2   : > { %v976_v0 = vpop.f32.mrf.mxu2 }
  0xe3   : > { %v977_v21 = vadd.f32 %v1959_v6, %v976_v0 }
  0xe7   : > { %1598 = vmatmul.msk.f32.gmra.mxu3 %vm715_vm5, %v712_v55  ;;  %1615 = vmatmul.msk.f32.gmra.mxu1 %vm715_vm5, %v849_v56 }
  0xea   : > { %v979_v12 = vpop.f32.mrf.mxu2 }
  0xeb   : > { %v980_v34 = vadd.f32 %v1959_v6, %v979_v12 }
  0xf2   : > { %v982_v28 = vpop.f32.mrf.mxu2 }
  0xf3   : > { %v983_v52 = vadd.f32 %v1959_v6, %v982_v28 }
  0xfa   : > { %v985_v49 = vpop.f32.mrf.mxu2 }
 0x121   : > { %v806_v60 = vpop.f32.mrf.mxu0 }
 0x129   : > { %v809_v63 = vpop.f32.mrf.mxu0 }
 0x12c   : > { %v885_v62 = vpop.f32.mrf.mxu1 }
 0x131   : > { %v812_v9 = vpop.f32.mrf.mxu0 }
 0x132   : > { %v749_v1 = vpop.f32.mrf.mxu3 }
 0x133   : > { %v807_v2 = vadd.f32 %v806_v60, %v749_v1 }
 0x134   : > { %v888_v7 = vpop.f32.mrf.mxu1 }
 0x135   : > { %v909_v8 = vadd.f32 %v885_v62, %v807_v2 }
 0x137   : > { %v918_v4 = vadd.f32 %v1954_v3, %v909_v8  ;;  %v988_v8 = vpop.f32.mrf.mxu2 }
 0x139   : > { %v926_v10 = vmax.f32 %v918_v4, 0.0  ;;  %v815_v24 = vpop.f32.mrf.mxu0 }
 0x13a   : > { %v752_v13 = vpop.f32.mrf.mxu3 }
 0x13b   : > { %v997_v14 = vadd.f32 %v974_v5, %v926_v10  ;;  %v810_v15 = vadd.f32 %v809_v63, %v752_v13 }
 0x13c   : > { %v891_v16 = vpop.f32.mrf.mxu1 }
 0x13d   : > { %v1005_v17 = vmax.f32 %v997_v14, 0.0  ;;  %v910_v18 = vadd.f32 %v888_v7, %v810_v15  ;;  %v986_v7 = vadd.f32 %v1959_v6, %v985_v49 }
 0x13f   : > { %v1022_v19 = vrot.slane %v1005_v17, 4  ;;  %v919_v20 = vadd.f32 %v1954_v3, %v910_v18 }
 0x141   : > { %v1038_v22 = vsel %vm446_vm0, 0.0, %v1022_v19  ;;  %v927_v23 = vmax.f32 %v919_v20, 0.0  ;;  %v818_v44 = vpop.f32.mrf.mxu0 }
 0x142   : > { %v755_v25 = vpop.f32.mrf.mxu3  ;;  %1634 = vmatmul.msk.f32.vlgmr.msra.gmra.mxu0 %vm715_vm5, %v1038_v22  ;;  %v1047_v37 = vrot.slane %v1038_v22, 2  ;;  %v1183_v38 = vrot.slane %v1038_v22, 4 }
 0x143   : > { %v1967_v26 = vadd.f32 %v977_v21, %v927_v23  ;;  %v813_v27 = vadd.f32 %v812_v9, %v755_v25 }
 0x144   : > { %v894_v29 = vpop.f32.mrf.mxu1 }
 0x145   : > { %v1006_v30 = vmax.f32 %v1967_v26, 0.0  ;;  %v911_v31 = vadd.f32 %v891_v16, %v813_v27 }
 0x147   : > { %v1023_v32 = vrot.slane %v1006_v30, 4  ;;  %v920_v33 = vadd.f32 %v1954_v3, %v911_v31 }
 0x149   : > { %v928_v35 = vmax.f32 %v920_v33, 0.0  ;;  %v1024_v36 = vsel %vm446_vm0, %v1022_v19, %v1023_v32  ;;  %v1050_v53 = vrot.slane %v1023_v32, 2  ;;  %v1186_v54 = vrot.slane %v1023_v32, 4  ;;  %v821_v0 = vpop.f32.mrf.mxu0  ;;  %v991_v32 = vpop.f32.mrf.mxu2 }
 0x14a   : > { %v758_v39 = vpop.f32.mrf.mxu3  ;;  %v1048_v40 = vrot.slane %v1024_v36, 2  ;;  %1635 = vmatmul.msk.f32.gmra.mxu0 %vm715_vm5, %v1024_v36  ;;  %v1184_v41 = vrot.slane %v1024_v36, 4 }
 0x14b   : > { %v999_v42 = vadd.f32 %v980_v34, %v928_v35  ;;  %v816_v43 = vadd.f32 %v815_v24, %v758_v39  ;;  %v989_v24 = vadd.f32 %v1959_v6, %v988_v8 }
 0x14c   : > { %v1049_v45 = vsel %vm551_vm3, %v1047_v37, %v1048_v40  ;;  %v1185_v46 = vsel %vm446_vm0, %v1183_v38, %v1184_v41  ;;  %v897_v50 = vpop.f32.mrf.mxu1  ;;  %v1051_v60 = vsel %vm551_vm3, %v1048_v40, %v1050_v53  ;;  %v1187_v61 = vsel %vm446_vm0, %v1184_v41, %v1186_v54 }
 0x14d   : > { %v1007_v47 = vmax.f32 %v999_v42, 0.0  ;;  %v912_v48 = vadd.f32 %v894_v29, %v816_v43  ;;  %1626 = vmatmul.msk.f32.vlgmr.msrb.gmra.mxu3 %vm715_vm5, %v1049_v45  ;;  %1643 = vmatmul.msk.f32.vlgmr.msra.gmra.mxu1 %vm715_vm5, %v1185_v46  ;;  %v992_v43 = vadd.f32 %v1959_v6, %v991_v32  ;;  %v2054_v32 = vld [vmem:[%s2123_s7] ss:$0 sm:$0xff] }
 0x14f   : > { %v1025_v51 = vrot.slane %v1007_v47, 4  ;;  %v921_v11 = vadd.f32 %v1954_v3, %v912_v48 }
 0x151   : > { %v929_v55 = vmax.f32 %v921_v11, 0.0  ;;  %v1039_v56 = vsel %vm446_vm0, 0.0, %v1025_v51  ;;  %v824_v25 = vpop.f32.mrf.mxu0 }
 0x152   : > { %v761_v57 = vpop.f32.mrf.mxu3  ;;  %1636 = vmatmul.msk.f32.gmra.mxu0 %vm715_vm5, %v1039_v56  ;;  %v1052_v10 = vrot.slane %v1039_v56, 2  ;;  %v1188_v12 = vrot.slane %v1039_v56, 4  ;;  %v994_v56 = vpop.f32.mrf.mxu2 }
 0x153   : > { %v1984_v58 = vadd.f32 %v983_v52, %v929_v55  ;;  %v819_v59 = vadd.f32 %v818_v44, %v761_v57 }
 0x154   : > { %v900_v4 = vpop.f32.mrf.mxu1 }
 0x155   : > { %v1008_v62 = vmax.f32 %v1984_v58, 0.0  ;;  %v913_v63 = vadd.f32 %v897_v50, %v819_v59  ;;  %1627 = vmatmul.msk.f32.gmra.mxu3 %vm715_vm5, %v1051_v60  ;;  %1644 = vmatmul.msk.f32.gmra.mxu1 %vm715_vm5, %v1187_v61 }
 0x157   : > { %v1026_v1 = vrot.slane %v1008_v62, 4  ;;  %v922_v2 = vadd.f32 %v1954_v3, %v913_v63  ;;  %v995_v63 = vadd.f32 %v1959_v6, %v994_v56 }
 0x159   : > { %v930_v5 = vmax.f32 %v922_v2, 0.0  ;;  %v1027_v9 = vsel %vm446_vm0, %v1025_v51, %v1026_v1  ;;  %v1055_v27 = vrot.slane %v1026_v1, 2  ;;  %v1191_v28 = vrot.slane %v1026_v1, 4  ;;  %v827_v46 = vpop.f32.mrf.mxu0 }
 0x15a   : > { %v764_v13 = vpop.f32.mrf.mxu3  ;;  %v1053_v14 = vrot.slane %v1027_v9, 2  ;;  %1637 = vmatmul.msk.f32.gmra.mxu0 %vm715_vm5, %v1027_v9  ;;  %v1189_v15 = vrot.slane %v1027_v9, 4 }
 0x15b   : > { %v1001_v16 = vadd.f32 %v986_v7, %v930_v5  ;;  %v822_v17 = vadd.f32 %v821_v0, %v764_v13 }
 0x15c   : > { %v1054_v18 = vsel %vm551_vm3, %v1052_v10, %v1053_v14  ;;  %v1190_v19 = vsel %vm446_vm0, %v1188_v12, %v1189_v15  ;;  %v903_v33 = vpop.f32.mrf.mxu1  ;;  %v1056_v37 = vsel %vm551_vm3, %v1053_v14, %v1055_v27  ;;  %v1192_v38 = vsel %vm446_vm0, %v1189_v15, %v1191_v28 }
 0x15d   : > { %v1009_v20 = vmax.f32 %v1001_v16, 0.0  ;;  %v914_v21 = vadd.f32 %v900_v4, %v822_v17  ;;  %1628 = vmatmul.msk.f32.gmra.mxu3 %vm715_vm5, %v1054_v18  ;;  %1645 = vmatmul.msk.f32.gmra.mxu1 %vm715_vm5, %v1190_v19 }
 0x15f   : > { %v1028_v22 = vrot.slane %v1009_v20, 4  ;;  %v923_v23 = vadd.f32 %v1954_v3, %v914_v21  ;;  %v1651_v21 = vld [vmem:[%s2122_s6 + $0x8] sm:$0xff] }
 0x160   : > { %1346 = vmatpush.msra.mxu2 %v1651_v21 }
 0x161   : > { %v931_v29 = vmax.f32 %v923_v23, 0.0  ;;  %v1040_v31 = vsel %vm446_vm0, 0.0, %v1028_v22  ;;  %v1308_v23 = vld [vmem:[%s2122_s6] sm:$0xff] }
 0x162   : > { %v767_v34 = vpop.f32.mrf.mxu3  ;;  %1638 = vmatmul.msk.f32.gmra.mxu0 %vm715_vm5, %v1040_v31  ;;  %v1057_v47 = vrot.slane %v1040_v31, 2  ;;  %v1193_v48 = vrot.slane %v1040_v31, 4  ;;  %1383 = vmatpush.msra.mxu3 %v1308_v23 }
 0x163   : > { %v2005_v35 = vadd.f32 %v989_v24, %v931_v29  ;;  %v825_v36 = vadd.f32 %v824_v25, %v767_v34 }
 0x164   : > { %v906_v53 = vpop.f32.mrf.mxu1 }
 0x165   : > { %v1010_v39 = vmax.f32 %v2005_v35, 0.0  ;;  %v915_v40 = vadd.f32 %v903_v33, %v825_v36  ;;  %1629 = vmatmul.msk.f32.gmra.mxu3 %vm715_vm5, %v1056_v37  ;;  %1646 = vmatmul.msk.f32.gmra.mxu1 %vm715_vm5, %v1192_v38 }
 0x167   : > { %v1029_v41 = vrot.slane %v1010_v39, 4  ;;  %v924_v42 = vadd.f32 %v1954_v3, %v915_v40 }
 0x169   : > { %v932_v44 = vmax.f32 %v924_v42, 0.0  ;;  %v1030_v45 = vsel %vm446_vm0, %v1028_v22, %v1029_v41  ;;  %v1060_v0 = vrot.slane %v1029_v41, 2  ;;  %v1196_v1 = vrot.slane %v1029_v41, 4 }
 0x16a   : > { %v770_v49 = vpop.f32.mrf.mxu3  ;;  %v1058_v50 = vrot.slane %v1030_v45, 2  ;;  %1639 = vmatmul.msk.f32.gmra.mxu0 %vm715_vm5, %v1030_v45  ;;  %v1194_v51 = vrot.slane %v1030_v45, 4 }
 0x16b   : > { %v1003_v11 = vadd.f32 %v992_v43, %v932_v44  ;;  %v828_v52 = vadd.f32 %v827_v46, %v770_v49 }
 0x16c   : > { %v1059_v54 = vsel %vm551_vm3, %v1057_v47, %v1058_v50  ;;  %v1195_v55 = vsel %vm446_vm0, %v1193_v48, %v1194_v51  ;;  %v1061_v4 = vsel %vm551_vm3, %v1058_v50, %v1060_v0  ;;  %v1197_v5 = vsel %vm446_vm0, %v1194_v51, %v1196_v1 }
 0x16d   : > { %v1011_v57 = vmax.f32 %v1003_v11, 0.0  ;;  %v916_v59 = vadd.f32 %v906_v53, %v828_v52  ;;  %1630 = vmatmul.msk.f32.gmra.mxu3 %vm715_vm5, %v1059_v54  ;;  %1647 = vmatmul.msk.f32.gmra.mxu1 %vm715_vm5, %v1195_v55 }
 0x16f   : > { %v1031_v60 = vrot.slane %v1011_v57, 4  ;;  %v925_v61 = vadd.f32 %v1954_v3, %v916_v59 }
 0x171   : > { %v933_v2 = vmax.f32 %v925_v61, 0.0  ;;  %v1041_v7 = vsel %vm446_vm0, 0.0, %v1031_v60 }
 0x172   : > { %1640 = vmatmul.msk.f32.gmra.mxu0 %vm715_vm5, %v1041_v7  ;;  %v1062_v10 = vrot.slane %v1041_v7, 2  ;;  %v1198_v12 = vrot.slane %v1041_v7, 4 }
 0x173   : > { %v2026_v8 = vadd.f32 %v995_v63, %v933_v2 }
 0x175   : > { %v1012_v9 = vmax.f32 %v2026_v8, 0.0  ;;  %1631 = vmatmul.msk.f32.gmra.mxu3 %vm715_vm5, %v1061_v4  ;;  %1648 = vmatmul.msk.f32.gmra.mxu1 %vm715_vm5, %v1197_v5 }
 0x177   : > { %v1032_v3 = vrot.slane %v1012_v9, 4 }
 0x179   : > { %v1033_v6 = vsel %vm446_vm0, %v1031_v60, %v1032_v3  ;;  %v1065_v17 = vrot.slane %v1032_v3, 2  ;;  %v1201_v18 = vrot.slane %v1032_v3, 4 }
 0x17a   : > { %v1063_v13 = vrot.slane %v1033_v6, 2  ;;  %1641 = vmatmul.msk.f32.gmra.mxu0 %vm715_vm5, %v1033_v6  ;;  %v1199_v14 = vrot.slane %v1033_v6, 4 }
 0x17c   : > { %v1064_v15 = vsel %vm551_vm3, %v1062_v10, %v1063_v13  ;;  %v1200_v16 = vsel %vm446_vm0, %v1198_v12, %v1199_v14  ;;  %v1066_v19 = vsel %vm551_vm3, %v1063_v13, %v1065_v17  ;;  %v1202_v20 = vsel %vm446_vm0, %v1199_v14, %v1201_v18  ;;  %v1660_v14 = vld [vmem:[%s2122_s6 + $0x10] sm:$0xff] }
 0x17d   : > { %1632 = vmatmul.msk.f32.gmra.mxu3 %vm715_vm5, %v1064_v15  ;;  %1649 = vmatmul.msk.f32.gmra.mxu1 %vm715_vm5, %v1200_v16 }
 0x17e   : > { %1422 = vmatpush.msrb.mxu2 %v1660_v14 }
 0x185   : > { %1633 = vmatmul.msk.f32.gmra.mxu3 %vm715_vm5, %v1066_v19  ;;  %1650 = vmatmul.msk.f32.gmra.mxu1 %vm715_vm5, %v1202_v20 }
 0x1bf   : > { %v1159_v22 = vpop.f32.mrf.mxu0 }
 0x1c7   : > { %v1162_v25 = vpop.f32.mrf.mxu0 }
 0x1ca   : > { %v1238_v24 = vpop.f32.mrf.mxu1 }
 0x1cf   : > { %v1165_v33 = vpop.f32.mrf.mxu0 }
 0x1d0   : > { %v1102_v27 = vpop.f32.mrf.mxu3 }
 0x1d1   : > { %v1160_v28 = vadd.f32 %v1159_v22, %v1102_v27 }
 0x1d2   : > { %v1241_v29 = vpop.f32.mrf.mxu1 }
 0x1d3   : > { %v1262_v31 = vadd.f32 %v1238_v24, %v1160_v28 }
 0x1d5   : > { %v1271_v34 = vadd.f32 %v2054_v32, %v1262_v31 }
 0x1d7   : > { %v1279_v41 = vmax.f32 %v1271_v34, 0.0  ;;  %v1168_v45 = vpop.f32.mrf.mxu0 }
 0x1d8   : > { %v1105_v36 = vpop.f32.mrf.mxu3 }
 0x1d9   : > { %v1163_v37 = vadd.f32 %v1162_v25, %v1105_v36  ;;  %v1296_v44 = vrot.slane %v1279_v41, 4  ;;  %v1309_v47 = vrot.slane %v1279_v41, 6 }
 0x1da   : > { %v1244_v38 = vpop.f32.mrf.mxu1 }
 0x1db   : > { %v1263_v40 = vadd.f32 %v1241_v29, %v1163_v37 }
 0x1dd   : > { %v1272_v42 = vadd.f32 %v2054_v32, %v1263_v40 }
 0x1df   : > { %v2058_v43 = vmax.f32 %v1272_v42, 0.0  ;;  %v1171_v57 = vpop.f32.mrf.mxu0 }
 0x1e0   : > { %v1108_v46 = vpop.f32.mrf.mxu3 }
 0x1e1   : > { %v1297_v48 = vrot.slane %v2058_v43, 4  ;;  %v1310_v49 = vrot.slane %v2058_v43, 6  ;;  %v1166_v50 = vadd.f32 %v1165_v33, %v1108_v46 }
 0x1e2   : > { %v1247_v51 = vpop.f32.mrf.mxu1 }
 0x1e3   : > { %v1311_v11 = vsel %vm380_vm1, %v1309_v47, %v1310_v49  ;;  %v1298_v52 = vsel %vm446_vm0, %v1296_v44, %v1297_v48  ;;  %v1264_v53 = vadd.f32 %v1244_v38, %v1166_v50 }
 0x1e4   : > { %1652 = vmatmul.msk.f32.vlgmr.msra.gmra.mxu2 %vm715_vm5, %v1311_v11  ;;  %1656 = vmatmul.msk.f32.vlgmr.msra.gmra.mxu3 %vm715_vm5, %v1298_v52 }
 0x1e5   : > { %v1273_v54 = vadd.f32 %v2054_v32, %v1264_v53 }
 0x1e7   : > { %v1281_v60 = vmax.f32 %v1273_v54, 0.0  ;;  %v1174_v12 = vpop.f32.mrf.mxu0 }
 0x1e8   : > { %v1111_v55 = vpop.f32.mrf.mxu3 }
 0x1e9   : > { %v1169_v56 = vadd.f32 %v1168_v45, %v1111_v55  ;;  %v1312_v2 = vrot.slane %v1281_v60, 6  ;;  %v1299_v5 = vrot.slane %v1281_v60, 4 }
 0x1ea   : > { %v1250_v61 = vpop.f32.mrf.mxu1 }
 0x1eb   : > { %v1265_v59 = vadd.f32 %v1247_v51, %v1169_v56 }
 0x1ed   : > { %v1274_v63 = vadd.f32 %v2054_v32, %v1265_v59 }
 0x1ef   : > { %v1282_v0 = vmax.f32 %v1274_v63, 0.0  ;;  %v1177_v22 = vpop.f32.mrf.mxu0 }
 0x1f0   : > { %v1114_v1 = vpop.f32.mrf.mxu3 }
 0x1f1   : > { %v1172_v7 = vadd.f32 %v1171_v57, %v1114_v1  ;;  %v1313_v4 = vrot.slane %v1282_v0, 6  ;;  %v1300_v3 = vrot.slane %v1282_v0, 4  ;;  %v1458_v1 = vld [vmem:[#allocation2] sm:$0x1] }
 0x1f2   : > { %v1253_v15 = vpop.f32.mrf.mxu1 }
 0x1f3   : > { %v1314_v6 = vsel %vm380_vm1, %v1312_v2, %v1313_v4  ;;  %v1301_v10 = vsel %vm446_vm0, %v1299_v5, %v1300_v3  ;;  %v1266_v13 = vadd.f32 %v1250_v61, %v1172_v7  ;;  %v1693_v2 = vmov 0   ;;  %v1684_v5 = vld [vmem:[%s2123_s7 + $0x1] ss:$0 sm:$0xff] }
 0x1f4   : > { %1653 = vmatmul.msk.f32.gmra.mxu2 %vm715_vm5, %v1314_v6  ;;  %1657 = vmatmul.msk.f32.gmra.mxu3 %vm715_vm5, %v1301_v10 }
 0x1f5   : > { %v1275_v16 = vadd.f32 %v2054_v32, %v1266_v13  ;;  %1679 = vset.pattern.permute.xlu0 %v1693_v2 }
 0x1f6   : > { %1461 = vperm.xlu0 %1679, %v1458_v1  }
 0x1f7   : > { %v1283_v20 = vmax.f32 %v1275_v16, 0.0  ;;  %v1180_v38 = vpop.f32.mrf.mxu0 }
 0x1f8   : > { %v1117_v17 = vpop.f32.mrf.mxu3 }
 0x1f9   : > { %v1175_v18 = vadd.f32 %v1174_v12, %v1117_v17  ;;  %v1315_v27 = vrot.slane %v1283_v20, 6  ;;  %v1302_v31 = vrot.slane %v1283_v20, 4 }
 0x1fa   : > { %v1256_v24 = vpop.f32.mrf.mxu1 }
 0x1fb   : > { %v1267_v19 = vadd.f32 %v1253_v15, %v1175_v18 }
 0x1fd   : > { %v1276_v21 = vadd.f32 %v2054_v32, %v1267_v19 }
 0x1ff   : > { %v1284_v23 = vmax.f32 %v1276_v21, 0.0 }
 0x200   : > { %v1120_v25 = vpop.f32.mrf.mxu3 }
 0x201   : > { %v1178_v28 = vadd.f32 %v1177_v22, %v1120_v25  ;;  %v1316_v29 = vrot.slane %v1284_v23, 6  ;;  %v1303_v33 = vrot.slane %v1284_v23, 4 }
 0x202   : > { %v1259_v44 = vpop.f32.mrf.mxu1 }
 0x203   : > { %v1317_v34 = vsel %vm380_vm1, %v1315_v27, %v1316_v29  ;;  %v1304_v36 = vsel %vm446_vm0, %v1302_v31, %v1303_v33  ;;  %v1268_v37 = vadd.f32 %v1256_v24, %v1178_v28 }
 0x204   : > { %1654 = vmatmul.msk.f32.gmra.mxu2 %vm715_vm5, %v1317_v34  ;;  %1658 = vmatmul.msk.f32.gmra.mxu3 %vm715_vm5, %v1304_v36 }
 0x205   : > { %v1277_v41 = vadd.f32 %v2054_v32, %v1268_v37  ;;  %v1457_v37 = vld [vmem:[%s2124_s8] sm:$0x1] }
 0x207   : > { %v1285_v46 = vmax.f32 %v1277_v41, 0.0 }
 0x208   : > { %v1123_v40 = vpop.f32.mrf.mxu3 }
 0x209   : > { %v1181_v42 = vadd.f32 %v1180_v38, %v1123_v40  ;;  %v1318_v49 = vrot.slane %v1285_v46, 6  ;;  %v1305_v51 = vrot.slane %v1285_v46, 4 }
 0x20b   : > { %v1269_v45 = vadd.f32 %v1259_v44, %v1181_v42 }
 0x20d   : > { %v1278_v47 = vadd.f32 %v2054_v32, %v1269_v45 }
 0x20f   : > { %v1286_v48 = vmax.f32 %v1278_v47, 0.0 }
 0x211   : > { %v1319_v50 = vrot.slane %v1286_v48, 6  ;;  %v1306_v11 = vrot.slane %v1286_v48, 4 }
 0x213   : > { %v1320_v52 = vsel %vm380_vm1, %v1318_v49, %v1319_v50  ;;  %v1307_v53 = vsel %vm446_vm0, %v1305_v51, %v1306_v11 }
 0x214   : > { %1655 = vmatmul.msk.f32.gmra.mxu2 %vm715_vm5, %v1320_v52  ;;  %1659 = vmatmul.msk.f32.gmra.mxu3 %vm715_vm5, %v1307_v53 }
 0x21c   : > { %1661 = vmatmul.msk.f32.vlgmr.msrb.gmra.mxu2 %vm715_vm5, %v2058_v43 }
 0x224   : > { %1662 = vmatmul.msk.f32.gmra.mxu2 %vm715_vm5, %v1282_v0 }
 0x22c   : > { %1663 = vmatmul.msk.f32.gmra.mxu2 %vm715_vm5, %v1284_v23 }
 0x234   : > { %1664 = vmatmul.msk.f32.gmra.mxu2 %vm715_vm5, %v1286_v48 }
 0x267   : > { %v1348_v32 = vpop.f32.mrf.mxu2  ;;  %v1385_v57 = vpop.f32.mrf.mxu3 }
 0x268   : > { %v1386_v7 = vadd.f32 %v1385_v57, %v1348_v32  ;;  %v1462_v8 = vpop.permute.xlu0 %1461 }
 0x277   : > { %v1351_v54 = vpop.f32.mrf.mxu2  ;;  %v1388_v60 = vpop.f32.mrf.mxu3 }
 0x278   : > { %v1389_v63 = vadd.f32 %v1388_v60, %v1351_v54 }
 0x287   : > { %v1354_v55 = vpop.f32.mrf.mxu2  ;;  %v1391_v0 = vpop.f32.mrf.mxu3 }
 0x288   : > { %v1392_v3 = vadd.f32 %v1391_v0, %v1354_v55 }
 0x297   : > { %v1357_v56 = vpop.f32.mrf.mxu2  ;;  %v1394_v16 = vpop.f32.mrf.mxu3 }
 0x298   : > { %v1395_v19 = vadd.f32 %v1394_v16, %v1357_v56 }
 0x29f   : > { %v1424_v59 = vpop.f32.mrf.mxu2 }
 0x2a0   : > { %v1436_v4 = vadd.f32 %v1424_v59, %v1386_v7 }
 0x2a2   : > { %v1441_v12 = vadd.f32 %v1684_v5, %v1436_v4 }
 0x2a4   : > { %v1445_v17 = vmax.f32 %v1441_v12, 0.0 }
 0x2a6   : > { %v1449_v23 = vadd.f32 %v1445_v17, %v1006_v30 }
 0x2a7   : > { %v1427_v61 = vpop.f32.mrf.mxu2 }
 0x2a8   : > { %v1437_v43 = vadd.f32 %v1427_v61, %v1389_v63  ;;  %v1453_v29 = vmax.f32 %v1449_v23, 0.0 }
 0x2aa   : > { %v1442_v6 = vadd.f32 %v1684_v5, %v1437_v43 }
 0x2ac   : > { %v1446_v14 = vmax.f32 %v1442_v6, 0.0 }
 0x2ae   : > { %v1450_v20 = vadd.f32 %v1446_v14, %v1008_v62  ;;  %v1469_v62 = vrot.slane %v1453_v29, 7 }
 0x2af   : > { %v1430_v10 = vpop.f32.mrf.mxu2 }
 0x2b0   : > { %v1438_v13 = vadd.f32 %v1430_v10, %v1392_v3  ;;  %v1454_v25 = vmax.f32 %v1450_v20, 0.0 }
 0x2b2   : > { %v1443_v15 = vadd.f32 %v1684_v5, %v1438_v13  ;;  %v1470_v33 = vrot.slane %v1454_v25, 6 }
 0x2b4   : > { %v1447_v18 = vmax.f32 %v1443_v15, 0.0  ;;  %v1472_v30 = vsel %vm1471_vm6, %v1470_v33, %v1469_v62 }
 0x2b6   : > { %v1451_v21 = vadd.f32 %v1447_v18, %v1010_v39 }
 0x2b7   : > { %v1433_v22 = vpop.f32.mrf.mxu2 }
 0x2b8   : > { %v1439_v24 = vadd.f32 %v1433_v22, %v1395_v19  ;;  %v1455_v28 = vmax.f32 %v1451_v21, 0.0 }
 0x2ba   : > { %v1444_v27 = vadd.f32 %v1684_v5, %v1439_v24  ;;  %v1473_v58 = vrot.slane %v1455_v28, 5 }
 0x2bc   : > { %v1448_v31 = vmax.f32 %v1444_v27, 0.0  ;;  %v1475_v39 = vsel %vm1474_vm7, %v1473_v58, %v1472_v30 }
 0x2be   : > { %v1452_v34 = vadd.f32 %v1448_v31, %v1012_v9  ;;  %v1464_v9 = vperm.slane %v1462_v8, 0 }
 0x2c0   : > { %v1456_v35 = vmax.f32 %v1452_v34, 0.0 }
 0x2c2   : > { %v1476_v26 = vrot.slane %v1456_v35, 4 }
 0x2c4   : > { %v1478_v36 = vsel %vm1477_vm8, %v1476_v26, %v1475_v39 }
 0x2c5   : > { %1665 = vmatpush.xpose.msk.msrb.mxu3 %vm715_vm5, %v1478_v36 }
 0x2c8   : > { %1666 = vmatmul.msk.f32.vlgmr.msrb.gmra.mxu3 %vm715_vm5, %v1457_v37 }
 0x34b   : > { %v1501_v38 = vpop.f32.mrf.mxu3 }
 0x34c   : > { %v1502_v40 = vadd.f32 %v1501_v38, %v1464_v9 }
 0x34e   : > { %1505 = vst.msk [vmem:[%s362_s23] sm:$0x1] %vm1504_vm9, %v1502_v40 }
 0x34f PF: > { %s22_s15 = sadd.s32 1, %s1691_s15  }
 0x350   : > { %p19_p5 = scmp.ge.s32.totalorder %s22_s15, 4  }
 0x352   :  { %21 = sbr.rel (!%p19_p5) target bundleno = 3 (0x3), region = 98 }

</bundles_post_ra>
